<compile_context>
chip_gen: v7x
topology: tpu7x:2x2x1
jax: 0.10.0
libtpu: 0.0.40
codegen_flags: <defaults>
</compile_context>

<pallas_src>
import jax
import jax.numpy as jnp
from jax import lax
from jax.experimental import pallas as pl
from jax.experimental.pallas import tpu as pltpu

# Deterministic "parameters" — identical to the Scharr filters in __init__.
# (The kernel uses their separable form: scharr_x = [3,10,3]^T (x) [-1,0,1],
#  scharr_y = [-1,0,1]^T (x) [3,10,3].)
SCHARR_X = ((-3.0, 0.0, 3.0), (-10.0, 0.0, 10.0), (-3.0, 0.0, 3.0))
SCHARR_Y = ((-3.0, -10.0, -3.0), (0.0, 0.0, 0.0), (3.0, 10.0, 3.0))


def _make_kernel(h):
    """Kernel over a (TILE_B*h, W) chunk of the batch-folded difference image."""
    h_pow2 = (h & (h - 1)) == 0

    def kernel(p_ref, t_ref, out_ref):
        R, W = p_ref.shape  # R = TILE_B * h

        # Linearity: SmoothL1's argument is conv(pred) - conv(target) = conv(d).
        d = p_ref[...].astype(jnp.float32) - t_ref[...].astype(jnp.float32)

        row = lax.broadcasted_iota(jnp.int32, (R, W), 0)
        col = lax.broadcasted_iota(jnp.int32, (R, W), 1)
        # Row index within each folded image (image boundaries act as zero pad).
        r_img = (row & (h - 1)) if h_pow2 else (row % h)

        not_first_col = col != 0
        not_last_col = col != (W - 1)
        not_first_row = r_img != 0
        not_last_row = r_img != (h - 1)
        zero = jnp.float32(0.0)

        # Register-resident shifted views of v with zero-padding semantics.
        # jnp.roll semantics: result[j] = v[(j - shift) mod n]; wrapped entries
        # are masked to zero (they correspond to the conv's zero halo).
        def sh_col_p(v):  # v[y, x+1]; 0 past the right edge
            return jnp.where(not_last_col, pltpu.roll(v, W - 1, axis=1), zero)

        def sh_col_m(v):  # v[y, x-1]; 0 past the left edge
            return jnp.where(not_first_col, pltpu.roll(v, 1, axis=1), zero)

        def sh_row_p(v):  # v[y+1, x]; 0 past the bottom edge of each image
            return jnp.where(not_last_row, pltpu.roll(v, R - 1, axis=0), zero)

        def sh_row_m(v):  # v[y-1, x]; 0 past the top edge of each image
            return jnp.where(not_first_row, pltpu.roll(v, 1, axis=0), zero)

        # Separable Scharr (cross-correlation, matching nn.Conv2d, padding=1):
        #   Gx = [3,10,3]^T applied over rows to DX,  DX = d[:, x+1] - d[:, x-1]
        dx = sh_col_p(d) - sh_col_m(d)
        gx = 10.0 * dx + 3.0 * (sh_row_m(dx) + sh_row_p(dx))

        #   Gy = [3,10,3] applied over cols to DY,    DY = d[y+1, :] - d[y-1, :]
        dy = sh_row_p(d) - sh_row_m(d)
        gy = 10.0 * dy + 3.0 * (sh_col_m(dy) + sh_col_p(dy))

        # SmoothL1 (beta = 1.0) per element; one combined cross-lane reduction.
        def huber(g):
            a = jnp.abs(g)
            return jnp.where(a < 1.0, 0.5 * g * g, a - 0.5)

        partial = jnp.sum(huber(gx) + huber(gy))
        # Lane-dense (1, 1, 128) unmasked store; wrapper reads [:, 0, 0].
        out_ref[...] = jnp.full(out_ref.shape, partial, jnp.float32)

    return kernel


def _choose_tile_b(B, H, W, elt, vmem_cap):
    """Images per grid step: divisor of B, VMEM/DMA aware, (8,·) aligned."""
    img_bytes = H * W * elt                      # one tensor, one image
    per_b = H * W * (2 * 2 * elt + 12 * 4)       # dbl-buffered inputs + f32 temps
    budget = max(8 * 1024 * 1024, vmem_cap - 24 * 1024 * 1024)
    cap = min(max(1, budget // per_b),           # fit in VMEM
              max(1, (4 * 1024 * 1024) // max(img_bytes, 1)),  # ~4 MiB DMA chunks
              B)
    if B >= 2:
        cap = min(cap, B // 2)                   # >= 2 grid steps (v7x megacore)
    best = None
    for d in range(1, cap + 1):
        if B % d == 0 and ((d * H) % 8 == 0 or d == B):
            best = d
    if best is None:
        return B  # block covers the whole folded array (always layout-legal)
    return best


def gradient_loss(pred, target):
    """pred, target: NCHW arrays with C == 1. Returns scalar f32 loss."""
    assert pred.shape == target.shape and pred.shape[1] == 1
    B, _, H, W = pred.shape

    # Keep f32/bf16 inputs in their native dtype over the DMA (upcast happens
    # inside the kernel); anything else is cast to f32 here.
    p = pred[:, 0]
    t = target[:, 0]
    if p.dtype not in (jnp.float32, jnp.bfloat16):
        p = p.astype(jnp.float32)
        t = t.astype(jnp.float32)
    elt = jnp.dtype(p.dtype).itemsize

    # Fold batch into rows: lane-dense (B*H, W) chunks, no wrapper-side pad.
    p2 = p.reshape(B * H, W)
    t2 = t.reshape(B * H, W)

    try:
        vmem_cap = int(pltpu.get_tpu_info().vmem_capacity_bytes)
    except Exception:  # conservative fallback (v7x-sized)
        vmem_cap = 64 * 1024 * 1024

    tile_b = _choose_tile_b(B, H, W, elt, vmem_cap)
    tile_r = tile_b * H
    num_steps = B // tile_b

    needed = tile_r * W * (2 * 2 * elt + 12 * 4) + (1 << 20)
    vmem_limit = int(min(max(needed, 32 * 1024 * 1024),
                         max(32 * 1024 * 1024, vmem_cap - 16 * 1024 * 1024)))

    cost = pl.CostEstimate(
        flops=26 * B * H * W,
        transcendentals=0,
        bytes_accessed=2 * B * H * W * elt + num_steps * 128 * 4,
    )

    partials = pl.pallas_call(
        _make_kernel(H),
        out_shape=jax.ShapeDtypeStruct((num_steps, 1, 128), jnp.float32),
        grid_spec=pltpu.PrefetchScalarGridSpec(
            num_scalar_prefetch=0,
            grid=(num_steps,),
            in_specs=[
                pl.BlockSpec((tile_r, W), lambda g: (g, 0)),
                pl.BlockSpec((tile_r, W), lambda g: (g, 0)),
            ],
            out_specs=pl.BlockSpec((1, 1, 128), lambda g: (g, 0, 0)),
        ),
        compiler_params=pltpu.CompilerParams(
            dimension_semantics=("parallel",),
            vmem_limit_bytes=vmem_limit,
        ),
        cost_estimate=cost,
    )(p2, t2)

    # loss_x + loss_y == (sum_x + sum_y) / (B*H*W); divide by N exactly once.
    return jnp.sum(partials[:, 0, 0]) / float(B * H * W)


def _reference_gradient_loss(pred, target):
    # Pure-JAX reference mirroring the PyTorch forward (4 explicit convs).
    wx = jnp.asarray(SCHARR_X, jnp.float32)
    wy = jnp.asarray(SCHARR_Y, jnp.float32)

    def conv(x, w):
        xp = jnp.pad(x[:, 0].astype(jnp.float32), ((0, 0), (1, 1), (1, 1)))
        B, Hp, Wp = xp.shape
        H, W = Hp - 2, Wp - 2
        acc = jnp.zeros((B, H, W), jnp.float32)
        for ky in range(3):
            for kx in range(3):
                acc = acc + w[ky, kx] * xp[:, ky:ky + H, kx:kx + W]
        return acc

    def smooth_l1(a, b):
        d = a - b
        ad = jnp.abs(d)
        return jnp.mean(jnp.where(ad < 1.0, 0.5 * d * d, ad - 0.5))

    return (smooth_l1(conv(pred, wx), conv(target, wx))
            + smooth_l1(conv(pred, wy), conv(target, wy)))


if __name__ == "__main__":
    key = jax.random.PRNGKey(0)
    k1, k2 = jax.random.split(key)
    B, C, H, W = 2, 1, 16, 128  # depth maps: NCHW with a single channel
    pred = jax.random.uniform(k1, (B, C, H, W), jnp.float32) * 5.0
    target = jax.random.uniform(k2, (B, C, H, W), jnp.float32) * 5.0

    loss = jax.block_until_ready(jax.jit(gradient_loss)(pred, target))
    ref = jax.block_until_ready(_reference_gradient_loss(pred, target))
    assert jnp.allclose(loss, ref, rtol=1e-4, atol=1e-4), (loss, ref)
    print("KERNEL_OK")
</pallas_src>

<mosaic_0001>
module attributes {stable_mosaic.version = 11 : i64} {
  func.func @kernel(%arg0: i32, %arg1: memref<16x128xf32, #tpu.memory_space<vmem>>, %arg2: memref<16x128xf32, #tpu.memory_space<vmem>>, %arg3: memref<1x1x128xf32, #tpu.memory_space<vmem>>) attributes {dimension_semantics = [#tpu.dimension_semantics<parallel>], iteration_bounds = array<i64: 2>, scalar_prefetch = 0 : i64, scratch_operands = 0 : i64, tpu.core_type = #tpu.core_type<tc>, window_params = [{transform_indices = @transform_0, window_bounds = array<i64: 16, 128>}, {transform_indices = @transform_1, window_bounds = array<i64: 16, 128>}, {transform_indices = @transform_2, window_bounds = array<i64: 1, 1, 128>}]} {
    %c0 = arith.constant 0 : index
    %c0_0 = arith.constant 0 : index
    %0 = vector.load %arg1[%c0, %c0_0] : memref<16x128xf32, #tpu.memory_space<vmem>>, vector<16x128xf32>
    %c0_1 = arith.constant 0 : index
    %c0_2 = arith.constant 0 : index
    %1 = vector.load %arg2[%c0_1, %c0_2] : memref<16x128xf32, #tpu.memory_space<vmem>>, vector<16x128xf32>
    %2 = arith.subf %0, %1 : vector<16x128xf32>
    %3 = tpu.iota {dimensions = array<i32: 0>} : vector<16x128xi32>
    %4 = tpu.iota {dimensions = array<i32: 1>} : vector<16x128xi32>
    %c15_i32 = arith.constant 15 : i32
    %5 = vector.broadcast %c15_i32 : i32 to vector<16x128xi32>
    %6 = arith.andi %3, %5 : vector<16x128xi32>
    %c0_i32 = arith.constant 0 : i32
    %7 = vector.broadcast %c0_i32 : i32 to vector<16x128xi32>
    %8 = arith.cmpi ne, %4, %7 : vector<16x128xi32>
    %c127_i32 = arith.constant 127 : i32
    %9 = vector.broadcast %c127_i32 : i32 to vector<16x128xi32>
    %10 = arith.cmpi ne, %4, %9 : vector<16x128xi32>
    %c0_i32_3 = arith.constant 0 : i32
    %11 = vector.broadcast %c0_i32_3 : i32 to vector<16x128xi32>
    %12 = arith.cmpi ne, %6, %11 : vector<16x128xi32>
    %c15_i32_4 = arith.constant 15 : i32
    %13 = vector.broadcast %c15_i32_4 : i32 to vector<16x128xi32>
    %14 = arith.cmpi ne, %6, %13 : vector<16x128xi32>
    %c127_i32_5 = arith.constant 127 : i32
    %15 = tpu.dynamic_rotate %2 by %c127_i32_5 dim 1 : vector<16x128xf32>, i32 -> vector<16x128xf32>
    %cst = arith.constant 0.000000e+00 : f32
    %16 = vector.broadcast %cst : f32 to vector<16x128xf32>
    %17 = arith.select %10, %15, %16 : vector<16x128xi1>, vector<16x128xf32>
    %c1_i32 = arith.constant 1 : i32
    %18 = tpu.dynamic_rotate %2 by %c1_i32 dim 1 : vector<16x128xf32>, i32 -> vector<16x128xf32>
    %cst_6 = arith.constant 0.000000e+00 : f32
    %19 = vector.broadcast %cst_6 : f32 to vector<16x128xf32>
    %20 = arith.select %8, %18, %19 : vector<16x128xi1>, vector<16x128xf32>
    %21 = arith.subf %17, %20 : vector<16x128xf32>
    %cst_7 = arith.constant 1.000000e+01 : f32
    %22 = vector.broadcast %cst_7 : f32 to vector<16x128xf32>
    %23 = arith.mulf %22, %21 : vector<16x128xf32>
    %c1_i32_8 = arith.constant 1 : i32
    %24 = tpu.dynamic_rotate %21 by %c1_i32_8 dim 0 : vector<16x128xf32>, i32 -> vector<16x128xf32>
    %cst_9 = arith.constant 0.000000e+00 : f32
    %25 = vector.broadcast %cst_9 : f32 to vector<16x128xf32>
    %26 = arith.select %12, %24, %25 : vector<16x128xi1>, vector<16x128xf32>
    %c15_i32_10 = arith.constant 15 : i32
    %27 = tpu.dynamic_rotate %21 by %c15_i32_10 dim 0 : vector<16x128xf32>, i32 -> vector<16x128xf32>
    %cst_11 = arith.constant 0.000000e+00 : f32
    %28 = vector.broadcast %cst_11 : f32 to vector<16x128xf32>
    %29 = arith.select %14, %27, %28 : vector<16x128xi1>, vector<16x128xf32>
    %30 = arith.addf %26, %29 : vector<16x128xf32>
    %cst_12 = arith.constant 3.000000e+00 : f32
    %31 = vector.broadcast %cst_12 : f32 to vector<16x128xf32>
    %32 = arith.mulf %31, %30 : vector<16x128xf32>
    %33 = arith.addf %23, %32 : vector<16x128xf32>
    %c15_i32_13 = arith.constant 15 : i32
    %34 = tpu.dynamic_rotate %2 by %c15_i32_13 dim 0 : vector<16x128xf32>, i32 -> vector<16x128xf32>
    %cst_14 = arith.constant 0.000000e+00 : f32
    %35 = vector.broadcast %cst_14 : f32 to vector<16x128xf32>
    %36 = arith.select %14, %34, %35 : vector<16x128xi1>, vector<16x128xf32>
    %c1_i32_15 = arith.constant 1 : i32
    %37 = tpu.dynamic_rotate %2 by %c1_i32_15 dim 0 : vector<16x128xf32>, i32 -> vector<16x128xf32>
    %cst_16 = arith.constant 0.000000e+00 : f32
    %38 = vector.broadcast %cst_16 : f32 to vector<16x128xf32>
    %39 = arith.select %12, %37, %38 : vector<16x128xi1>, vector<16x128xf32>
    %40 = arith.subf %36, %39 : vector<16x128xf32>
    %cst_17 = arith.constant 1.000000e+01 : f32
    %41 = vector.broadcast %cst_17 : f32 to vector<16x128xf32>
    %42 = arith.mulf %41, %40 : vector<16x128xf32>
    %c1_i32_18 = arith.constant 1 : i32
    %43 = tpu.dynamic_rotate %40 by %c1_i32_18 dim 1 : vector<16x128xf32>, i32 -> vector<16x128xf32>
    %cst_19 = arith.constant 0.000000e+00 : f32
    %44 = vector.broadcast %cst_19 : f32 to vector<16x128xf32>
    %45 = arith.select %8, %43, %44 : vector<16x128xi1>, vector<16x128xf32>
    %c127_i32_20 = arith.constant 127 : i32
    %46 = tpu.dynamic_rotate %40 by %c127_i32_20 dim 1 : vector<16x128xf32>, i32 -> vector<16x128xf32>
    %cst_21 = arith.constant 0.000000e+00 : f32
    %47 = vector.broadcast %cst_21 : f32 to vector<16x128xf32>
    %48 = arith.select %10, %46, %47 : vector<16x128xi1>, vector<16x128xf32>
    %49 = arith.addf %45, %48 : vector<16x128xf32>
    %cst_22 = arith.constant 3.000000e+00 : f32
    %50 = vector.broadcast %cst_22 : f32 to vector<16x128xf32>
    %51 = arith.mulf %50, %49 : vector<16x128xf32>
    %52 = arith.addf %42, %51 : vector<16x128xf32>
    %53 = math.absf %33 : vector<16x128xf32>
    %cst_23 = arith.constant 1.000000e+00 : f32
    %54 = vector.broadcast %cst_23 : f32 to vector<16x128xf32>
    %55 = arith.cmpf olt, %53, %54 : vector<16x128xf32>
    %cst_24 = arith.constant 5.000000e-01 : f32
    %56 = vector.broadcast %cst_24 : f32 to vector<16x128xf32>
    %57 = arith.mulf %56, %33 : vector<16x128xf32>
    %58 = arith.mulf %57, %33 : vector<16x128xf32>
    %cst_25 = arith.constant 5.000000e-01 : f32
    %59 = vector.broadcast %cst_25 : f32 to vector<16x128xf32>
    %60 = arith.subf %53, %59 : vector<16x128xf32>
    %61 = arith.select %55, %58, %60 : vector<16x128xi1>, vector<16x128xf32>
    %62 = math.absf %52 : vector<16x128xf32>
    %cst_26 = arith.constant 1.000000e+00 : f32
    %63 = vector.broadcast %cst_26 : f32 to vector<16x128xf32>
    %64 = arith.cmpf olt, %62, %63 : vector<16x128xf32>
    %cst_27 = arith.constant 5.000000e-01 : f32
    %65 = vector.broadcast %cst_27 : f32 to vector<16x128xf32>
    %66 = arith.mulf %65, %52 : vector<16x128xf32>
    %67 = arith.mulf %66, %52 : vector<16x128xf32>
    %cst_28 = arith.constant 5.000000e-01 : f32
    %68 = vector.broadcast %cst_28 : f32 to vector<16x128xf32>
    %69 = arith.subf %62, %68 : vector<16x128xf32>
    %70 = arith.select %64, %67, %69 : vector<16x128xi1>, vector<16x128xf32>
    %71 = arith.addf %61, %70 : vector<16x128xf32>
    %72 = vector.shape_cast %71 : vector<16x128xf32> to vector<1x16x128xf32>
    %cst_29 = arith.constant dense<0.000000e+00> : vector<1xf32>
    %73 = vector.multi_reduction <add>, %72, %cst_29 [1, 2] : vector<1x16x128xf32> to vector<1xf32>
    %74 = vector.shape_cast %73 : vector<1xf32> to vector<1x1x1xf32>
    %75 = vector.extract %74[0, 0, 0] : f32 from vector<1x1x1xf32>
    %76 = vector.broadcast %75 : f32 to vector<1x1x128xf32>
    %c0_30 = arith.constant 0 : index
    %c0_31 = arith.constant 0 : index
    %c0_32 = arith.constant 0 : index
    %77 = vector.load %arg3[%c0_30, %c0_31, %c0_32] : memref<1x1x128xf32, #tpu.memory_space<vmem>>, vector<1x1x128xf32>
    tpu.vector_store %arg3[%c0_30, %c0_31, %c0_32], %76 {strides = array<i32>} : memref<1x1x128xf32, #tpu.memory_space<vmem>>, vector<1x1x128xf32>,
    return
  }
  func.func @transform_0(%arg0: i32) -> (i32, i32) {
    %c0_i32 = arith.constant 0 : i32
    %c0_i32_0 = arith.constant 0 : i32
    return %arg0, %c0_i32 : i32, i32
  }
  func.func @transform_1(%arg0: i32) -> (i32, i32) {
    %c0_i32 = arith.constant 0 : i32
    %c0_i32_0 = arith.constant 0 : i32
    return %arg0, %c0_i32 : i32, i32
  }
  func.func @transform_2(%arg0: i32) -> (i32, i32, i32) {
    %c0_i32 = arith.constant 0 : i32
    %c0_i32_0 = arith.constant 0 : i32
    %c0_i32_1 = arith.constant 0 : i32
    return %arg0, %c0_i32, %c0_i32_0 : i32, i32, i32
  }
}

</mosaic_0001>

<bundles_post_ra>
// kernel: gradient_loss.1
= control target key start
LH: loop header
LB: loop body
LE: loop exit
PB: predicated region body
PF: predicated region fallthrough
CT: control target
= control target key end

     0   :  { %7 = vsyncpa [#allocation3], 0  ;;  %s814_s0 = inlined_call_operand.hbm [shape: f32[32,128], index: 0, kind: input, shape index: {}]   ;;  %s815_s1 = inlined_call_operand.hbm [shape: f32[32,128], index: 1, kind: input, shape index: {}]   ;;  %s816_s2 = inlined_call_operand.vmem [shape: f32[2,1,128], index: 2, kind: output, shape index: {}]  }
   0x1   :  { %9 = vsyncpa [#allocation3 + $0x1], 0 }
   0x2   :  { %10 = vsyncpa [#allocation5], 0 }
   0x3   :  { %12 = vsyncpa [#allocation5 + $0x1], 0  ;;  %s602_s9 = smov 0   ;;  %s604_s10 = smov 0  }
   0x4   :  { %s606_s11 = smov 0   ;;  %s608_s12 = smov 0  }
   0x5 LB: > { %s621_s13 = sadd.s32 4294967295, %s579_s12   ;;  %s624_s14 = sadd.s32 1, %s579_s12   ;;  %s579_s12 = sphi %s608_s12, %s834_s12   ;;  %s575_s11 = sphi %s606_s11, %s833_s11   ;;  %s571_s10 = sphi %s604_s10, %s832_s10   ;;  %s567_s9 = sphi %s602_s9, %s831_s9  }
   0x6   : > { %s22_s15 = ssub.s32 %s579_s12, %s624_s14  ;;  %s25_s16 = sadd.s32 1, %s575_s11 }
   0x7   : > { %p23_p0 = scmp.eq.s32.totalorder %s22_s15, 0  ;;  %p32_p1 = scmp.ne.s32.totalorder %s575_s11, %s571_s10 }
   0x8   : > { %p33_p2 = scmp.eq.s32.totalorder %s579_s12, 0  ;;  %p38_p3 = scmp.ne.s32.totalorder %s571_s10, %s567_s9 }
   0x9   : > { %s634_s17 = scalar_select %p23_p0, %s575_s11, %s25_s16  }
   0xa   : > { %p34_p4 = por %p33_p2, %p32_p1  ;;  %p39_p5 = scmp.eq.s32.totalorder %s621_s13, 0 }
   0xb   : > { %p444_p6 = scmp.lt.s32.totalorder %s579_s12, 2  ;;  %s643_s19 = sand.u32 1, %s575_s11  }
   0xc   : > { %p638_p7 = por %p39_p5, %p38_p3  ;;  %s414_s20 = sshll.u32 %s643_s19, 4 }
   0xd   : > { %s429_s21 = sshll.u32 %s579_s12, 8  ;;  %s118_s25 = scalar_lea.vmem [#allocation2], %s414_s20 }
   0xe   : > { %s818_s18 = scalar_select %p638_p7, 1, 0 }
   0xf   : > { %s652_s24 = scalar_lea.hbm %s814_s0, %s429_s21  ;;  %s125_s26 = sshll.u32 %s118_s25, 4  ;;  %s656_s26 = int_to_ptr.vmem [resolvable:$true] %s125_s26 }
  0x10   : > { %p658_p8 = pnand %p444_p6, %p34_p4  ;;  %s115_s28 = scalar_lea.sflag [#allocation3], %s643_s19 }
  0x11   : > { %s481_s29 = scalar_lea.hbm %s652_s24, 256  ;;  %s486_s4 = scalar_lea.hbm %s814_s0, 512 }
  0x12   : > { %p482_p10 = scmp.ne.s32.totalorder %s652_s24, %s481_s29  ;;  %p483_p11 = pneg %p658_p8 }
  0x13   : > { %p487_p0 = scmp.lt.u32.totalorder %s652_s24, %s814_s0  ;;  %p488_p1 = scmp.lt.u32.totalorder %s486_s4, %s481_s29 }
  0x14   : > { %p484_p12 = pnand %p483_p11, %p482_p10  ;;  %p490_p3 = scmp.lt.u32.totalorder %s481_s29, %s652_s24 }
  0x15   : > { %p489_p2 = por %p488_p1, %p487_p0 }
  0x16   : > { %p485_p13 = pneg %p484_p12 }
  0x17   : > { %p491_p4 = por %p490_p3, %p489_p2 }
  0x19   : > { %p492_p5 = pnand %p491_p4, %p485_p13 }
  0x1b   : > { %495 = shalt.err (!%p492_p5)
}
  0x1c   : > { %s496_s7 = scalar_lea.vmem %s656_s26, 256  ;;  %s581_s8 = smov [#allocation2]  }
  0x1d   : > { %p497_p6 = scmp.ne.s32.totalorder %s656_s26, %s496_s7  ;;  %s501_s9 = sshll.u32 %s581_s8, 4  ;;  %s502_s9 = int_to_ptr.vmem [resolvable:$false] %s501_s9 }
  0x1e   : > { %s503_s15 = scalar_lea.vmem %s502_s9, 512  ;;  %p504_p9 = scmp.lt.s32.totalorder %s656_s26, %s502_s9 }
  0x1f   : > { %p499_p10 = pnand %p497_p6, %p483_p11  ;;  %p505_p0 = scmp.lt.s32.totalorder %s503_s15, %s496_s7 }
  0x21   : > { %p500_p12 = pneg %p499_p10  ;;  %p506_p1 = por %p505_p0, %p504_p9 }
  0x23   : > { %p507_p2 = pnand %p506_p1, %p500_p12 }
  0x25   : > { %510 = shalt.err (!%p507_p2)
}
  0x26   : > { %s582_s16 = smov 128   ;;  %s583_s22 = smov 8  }
  0x27   : > { %440 = dma.hbm_to_vmem [thread:$0]  (!%p658_p8), %s652_s24, 256, %s656_s26, %s115_s28, %s582_s16, %s582_s16, %s583_s22  }
  0x28   : > { %p154_p9 = scmp.lt.s32.totalorder %s579_s12, 3  ;;  %s700_s29 = scalar_lea.hbm %s815_s1, %s429_s21 }
  0x29   : > { %p820_p13 = scmp.ge.s32.totalorder %s579_s12, 1  ;;  %s139_s3 = scalar_lea.vmem [#allocation4], %s414_s20 }
  0x2a   : > { %s146_s4 = sshll.u32 %s139_s3, 4  ;;  %s136_s24 = scalar_lea.sflag [#allocation5], %s643_s19  ;;  %s710_s4 = int_to_ptr.vmem [resolvable:$true] %s146_s4 }
  0x2b   : > { %p704_p3 = pnand %p820_p13, %p154_p9  ;;  %s511_s26 = scalar_lea.hbm %s700_s29, 256 }
  0x2c   : > { %p512_p4 = scmp.ne.s32.totalorder %s700_s29, %s511_s26  ;;  %s516_s28 = scalar_lea.hbm %s815_s1, 512 }
  0x2d   : > { %p517_p10 = scmp.lt.u32.totalorder %s700_s29, %s815_s1  ;;  %p518_p12 = scmp.lt.u32.totalorder %s516_s28, %s511_s26 }
  0x2e   : > { %p514_p5 = pnand %p512_p4, %p483_p11  ;;  %p520_p1 = scmp.lt.u32.totalorder %s511_s26, %s700_s29 }
  0x2f   : > { %p519_p0 = por %p518_p12, %p517_p10 }
  0x30   : > { %p515_p6 = pneg %p514_p5 }
  0x31   : > { %p521_p2 = por %p520_p1, %p519_p0 }
  0x33   : > { %p522_p9 = pnand %p521_p2, %p515_p6 }
  0x35   : > { %525 = shalt.err (!%p522_p9)
}
  0x36   : > { %s526_s20 = scalar_lea.vmem %s710_s4, 256  ;;  %s584_s7 = smov [#allocation4]  }
  0x37   : > { %p527_p13 = scmp.ne.s32.totalorder %s710_s4, %s526_s20  ;;  %s531_s8 = sshll.u32 %s584_s7, 4  ;;  %s532_s8 = int_to_ptr.vmem [resolvable:$false] %s531_s8 }
  0x38   : > { %s533_s9 = scalar_lea.vmem %s532_s8, 512  ;;  %p534_p7 = scmp.lt.s32.totalorder %s710_s4, %s532_s8 }
  0x39   : > { %p529_p4 = pnand %p527_p13, %p483_p11  ;;  %p535_p10 = scmp.lt.s32.totalorder %s533_s9, %s526_s20 }
  0x3b   : > { %p530_p5 = pneg %p529_p4  ;;  %p536_p12 = por %p535_p10, %p534_p7 }
  0x3d   : > { %p537_p0 = pnand %p536_p12, %p530_p5 }
  0x3f   : > { %540 = shalt.err (!%p537_p0)
}
  0x40   : > { %443 = dma.hbm_to_vmem [thread:$0]  (!%p658_p8), %s700_s29, 256, %s710_s4, %s136_s24, %s582_s16, %s582_s16, %s583_s22  }
  0x41   : > { %158 = sbr.rel (%p704_p3) target bundleno = 429 (0x1ad), region = 28  ;;  %s160_s15 = sand.u32 (!%p704_p3), 1, %s571_s10  }
  0x42   : > { %s421_s23 = sshll.u32 (!%p704_p3), %s160_s15, 4  ;;  %s161_s25 = scalar_lea.sflag (!%p704_p3), [#allocation3], %s160_s15 }
  0x43   : > { %s164_s3 = scalar_lea.vmem (!%p704_p3), [#allocation2], %s421_s23  ;;  %p822_p7 = scmp.ne.s32.totalorder (!%p704_p3), %s818_s18, 0 }
  0x48   : > { %558 = dma.done.wait (%p822_p7), %s161_s25, 256  }
  0x49   : > { %560 = vsyncadd (%p822_p7), %s161_s25, 4294967040  ;;  %s170_s27 = scalar_lea.sflag [#allocation5], %s160_s15  ;;  %s173_s19 = scalar_lea.vmem [#allocation4], %s421_s23 }
  0x4a   : > { %562 = dma.done.wait (%p822_p7), %s170_s27, 256  }
  0x4b   : > { %564 = vsyncadd (%p822_p7), %s170_s27, 4294967040  ;;  %v208_v0 = vlaneseq  ;;  %v202_v3 = vld [vmem:[%s164_s3] sm:$0xff]  ;;  %v203_v5 = vld [vmem:[%s164_s3 + $0x8] sm:$0xff]  ;;  %s585_s16 = smov 1   ;;  %s586_s22 = smov 127  }
  0x4c   : > { %v204_v4 = vld [vmem:[%s173_s19] sm:$0xff]  ;;  %v205_v9 = vld [vmem:[%s173_s19 + $0x8] sm:$0xff]  ;;  %p199_p8 = scmp.lt.s32.totalorder %s621_s13, 1 }
  0x4d   : > { %v209_v1 = vshrl.u32 %v208_v0, 7  ;;  %v206_v8 = vsub.f32 %v202_v3, %v204_v4  ;;  %v207_v10 = vsub.f32 %v203_v5, %v205_v9  ;;  %v212_v25 = vand.u32 127, %v208_v0 }
  0x4e   : > { %s836_s13 = smov (!%p199_p8, %s621_s13), 1 }
  0x4f   : > { %v210_v2 = vadd.s32 8, %v209_v1  ;;  %v213_v7 = vand.u32 15, %v209_v1  ;;  %227 = vrot.lane.b32.xlu1 %v206_v8, %s585_s16  ;;  %221 = vrot.lane.b32.xlu0 %v206_v8, %s586_s22  ;;  %vm239_vm0 = vcmp.lt.s32.totalorder %v209_v1, 1  ;;  %vm246_vm1 = vcmp.lt.s32.totalorder %v209_v1, 7  ;;  %s201_s30 = scalar_lea.vmem %s816_s2, %s836_s13 }
  0x50   : > { %v257_v11 = vrot.slane %v206_v8, 1  ;;  %v263_v12 = vrot.slane %v206_v8, 7  ;;  %v258_v14 = vrot.slane %v207_v10, 1  ;;  %v264_v15 = vrot.slane %v207_v10, 7 }
  0x51   : > { %v214_v6 = vand.u32 15, %v210_v2  ;;  %vm756_vm3 = vcmp.ne.s32.totalorder %v213_v7, 0  ;;  %vm215_vm4 = vcmp.ne.s32.totalorder %v212_v25, 0  ;;  %vm216_vm5 = vcmp.ne.s32.totalorder %v212_v25, 127 }
  0x52   : > { %v260_v17 = vsel %vm246_vm1, %v258_v14, %v257_v11  ;;  %v265_v18 = vsel %vm239_vm0, %v263_v12, %v264_v15  ;;  %v259_v19 = vsel %vm246_vm1, %v257_v11, %v258_v14  ;;  %v266_v20 = vsel %vm239_vm0, %v264_v15, %v263_v12 }
  0x53   : > { %vm752_vm2 = vcmp.ne.s32.totalorder %v214_v6, 15  ;;  %229 = vrot.lane.b32.xlu1 %v207_v10, %s585_s16  ;;  %223 = vrot.lane.b32.xlu0 %v207_v10, %s586_s22  ;;  %v267_v22 = vsel %vm756_vm3, %v266_v20, 0.0 }
  0x54   : > { %v262_v21 = vsel %vm752_vm2, %v260_v17, 0.0  ;;  %v269_v24 = vsub.f32 %v259_v19, %v267_v22 }
  0x55   : > { %v270_v23 = vsub.f32 %v262_v21, %v265_v18 }
  0x56   : > { %v271_v49 = vmul.f32 10.0, %v269_v24 }
  0x57   : > { %275 = vrot.lane.b32.xlu1 %v270_v23, %s585_s16  ;;  %273 = vrot.lane.b32.xlu0 %v269_v24, %s585_s16  ;;  %v272_v48 = vmul.f32 10.0, %v270_v23 }
  0x5b   : > { %281 = vrot.lane.b32.xlu1 %v270_v23, %s586_s22  ;;  %279 = vrot.lane.b32.xlu0 %v269_v24, %s586_s22 }
  0xc1   : > { %v228_v26 = vpop.permute.xlu1 %227  ;;  %v222_v27 = vpop.permute.xlu0 %221 }
  0xc2   : > { %v231_v28 = vsel %vm215_vm4, %v228_v26, 0.0  ;;  %v225_v29 = vsel %vm216_vm5, %v222_v27, 0.0 }
  0xc3   : > { %v233_v30 = vsub.f32 %v225_v29, %v231_v28 }
  0xc5   : > { %v230_v31 = vpop.permute.xlu1 %229  ;;  %v224_v32 = vpop.permute.xlu0 %223  ;;  %v237_v36 = vrot.slane %v233_v30, 7  ;;  %v244_v37 = vrot.slane %v233_v30, 1  ;;  %v235_v50 = vmul.f32 10.0, %v233_v30 }
  0xc6   : > { %v232_v33 = vsel %vm215_vm4, %v230_v31, 0.0  ;;  %v226_v34 = vsel %vm216_vm5, %v224_v32, 0.0 }
  0xc7   : > { %v234_v35 = vsub.f32 %v226_v34, %v232_v33 }
  0xc9   : > { %v238_v38 = vrot.slane %v234_v35, 7  ;;  %v245_v39 = vrot.slane %v234_v35, 1  ;;  %v276_v40 = vpop.permute.xlu1 %275  ;;  %v274_v41 = vpop.permute.xlu0 %273  ;;  %v236_v51 = vmul.f32 10.0, %v234_v35 }
  0xca   : > { %v278_v56 = vsel %vm215_vm4, %v276_v40, 0.0  ;;  %v277_v57 = vsel %vm215_vm4, %v274_v41, 0.0 }
  0xcb   : > { %v240_v42 = vsel %vm239_vm0, %v237_v36, %v238_v38  ;;  %v241_v43 = vsel %vm239_vm0, %v238_v38, %v237_v36  ;;  %v247_v44 = vsel %vm246_vm1, %v244_v37, %v245_v39  ;;  %v248_v45 = vsel %vm246_vm1, %v245_v39, %v244_v37 }
  0xcc   : > { %v242_v46 = vsel %vm756_vm3, %v241_v43, 0.0  ;;  %v250_v47 = vsel %vm752_vm2, %v248_v45, 0.0 }
  0xcd   : > { %v251_v52 = vadd.f32 %v247_v44, %v242_v46  ;;  %v252_v53 = vadd.f32 %v250_v47, %v240_v42  ;;  %v282_v54 = vpop.permute.xlu1 %281  ;;  %v280_v55 = vpop.permute.xlu0 %279 }
  0xce   : > { %v284_v58 = vsel %vm216_vm5, %v282_v54, 0.0  ;;  %v283_v59 = vsel %vm216_vm5, %v280_v55, 0.0 }
  0xcf   : > { %v253_v60 = vmul.f32 3.0, %v251_v52  ;;  %v254_v61 = vmul.f32 3.0, %v252_v53  ;;  %v286_v62 = vadd.f32 %v284_v58, %v278_v56  ;;  %v285_v63 = vadd.f32 %v283_v59, %v277_v57 }
  0xd1   : > { %v256_v0 = vadd.f32 %v254_v61, %v236_v51  ;;  %v288_v1 = vmul.f32 3.0, %v286_v62  ;;  %v287_v2 = vmul.f32 3.0, %v285_v63  ;;  %v255_v3 = vadd.f32 %v253_v60, %v235_v50 }
  0xd3   : > { %v290_v4 = vadd.f32 %v288_v1, %v272_v48  ;;  %v289_v5 = vadd.f32 %v287_v2, %v271_v49  ;;  %v291_v6 = vand.u32 2147483647, %v255_v3  ;;  %v292_v7 = vand.u32 2147483647, %v256_v0 }
  0xd4   : > { %v295_v8 = vmul.f32 0.5, %v255_v3  ;;  %v296_v9 = vmul.f32 0.5, %v256_v0 }
  0xd5   : > { %v304_v10 = vand.u32 2147483647, %v290_v4  ;;  %v308_v11 = vmul.f32 0.5, %v290_v4  ;;  %v303_v12 = vand.u32 2147483647, %v289_v5  ;;  %v307_v13 = vmul.f32 0.5, %v289_v5 }
  0xd6   : > { %vm784_vm6 = vcmp.lt.f32.partialorder %v291_v6, 1.0  ;;  %vm788_vm7 = vcmp.lt.f32.partialorder %v292_v7, 1.0  ;;  %v297_v16 = vmul.f32 %v295_v8, %v255_v3  ;;  %v298_v17 = vmul.f32 %v296_v9, %v256_v0 }
  0xd7   : > { %v310_v18 = vmul.f32 %v308_v11, %v290_v4  ;;  %v309_v19 = vmul.f32 %v307_v13, %v289_v5  ;;  %v423_v20 = vadd.f32 -0.5, %v291_v6  ;;  %v424_v21 = vadd.f32 -0.5, %v292_v7 }
  0xd8   : > { %vm305_vm8 = vcmp.lt.f32.partialorder %v303_v12, 1.0  ;;  %vm306_vm9 = vcmp.lt.f32.partialorder %v304_v10, 1.0  ;;  %v425_v22 = vadd.f32 -0.5, %v303_v12  ;;  %v426_v23 = vadd.f32 -0.5, %v304_v10 }
  0xd9   : > { %v301_v24 = vsel %vm784_vm6, %v297_v16, %v423_v20  ;;  %v302_v25 = vsel %vm788_vm7, %v298_v17, %v424_v21 }
  0xda   : > { %v313_v26 = vsel %vm305_vm8, %v309_v19, %v425_v22  ;;  %v314_v27 = vsel %vm306_vm9, %v310_v18, %v426_v23 }
  0xdb   : > { %v315_v28 = vadd.f32 %v313_v26, %v301_v24  ;;  %v316_v29 = vadd.f32 %v314_v27, %v302_v25 }
  0xdd   : > { %v317_v30 = vadd.f32 %v316_v29, %v315_v28 }
  0xdf   : > { %318 = vadd.xlane.f32.xlu0 %v317_v30 }
 0x16c   : > { %v319_v31 = vpop.xlane.xlu0 %318 }
 0x16d   : > { %v320_v32 = vrot.slane %v319_v31, 4 }
 0x16f   : > { %v321_v33 = vadd.f32 %v320_v32, %v319_v31 }
 0x171   : > { %v322_v34 = vrot.slane %v321_v33, 2 }
 0x173   : > { %v323_v35 = vadd.f32 %v322_v34, %v321_v33 }
 0x175   : > { %v324_v36 = vrot.slane %v323_v35, 1 }
 0x177   : > { %v325_v37 = vadd.f32 %v324_v36, %v323_v35 }
 0x179   : > { %431 = vpush %v325_v37 }
 0x1aa   : > { %s432_s4 = spop %431 }
 0x1ab   : > { %v327_v38 = vstv %s432_s4 }
 0x1ac   : > { %328 = vst [vmem:[%s201_s30] sm:$0x1] %v327_v38 }
 0x1ad PF: > { %p15_p11 = scmp.ge.s32.totalorder %s624_s14, 4   ;;  %s831_s9 = smov %s571_s10 }
 0x1ae   : > { %s832_s10 = smov %s575_s11  ;;  %s833_s11 = smov %s634_s17 }
 0x1af   : > { %s834_s12 = smov %s624_s14  ;;  %17 = sbr.rel (!%p15_p11) target bundleno = 5 (0x5), region = 81 }
 0x1b6   :  { %346 = vsyncpa [#allocation3], 1 }
 0x1b7   :  { %348 = vsyncpa [#allocation3 + $0x1], 1 }
 0x1b8   :  { %349 = vsyncpa [#allocation5], 1 }
 0x1b9   :  { %351 = vsyncpa [#allocation5 + $0x1], 1 }

</bundles_post_ra>
